<compile_context>
chip_gen: v7x
topology: tpu7x:2x2x1
jax: 0.10.0
libtpu: 0.0.40
codegen_flags: <defaults>
</compile_context>

<pallas_src>
import functools

import jax
import jax.numpy as jnp
from jax.experimental import pallas as pl
from jax.experimental.pallas import tpu as pltpu


# ----------------------------------------------------------------------------
# Fused kernel: Linear forward (MXU matmul + bias) + per-tile stat partials.
#
# Grid (nk > 1): (nm, nn, nk)  i over batch tiles, j over out-feature tiles,
#                              k over reduction tiles (innermost, "arbitrary").
# Grid (nk == 1): (nm, nn)     no accumulator scratch needed.
#
# Outputs:
#   y_ref    : (tm, tn) tile of y = x @ W + b
#   psum_ref : (1, 1, 8, tn) 8-sublane partial column sums of the y tile
#   psq_ref  : (1, 1, 8, tn) 8-sublane partial column sums of y*y
# Scratch (nk > 1 only):
#   acc_ref  : (tm, tn) f32 matmul accumulator over k
# ----------------------------------------------------------------------------
def _write_partial_stats(y_f32, psum_ref, psq_ref):
    tm, tn = y_f32.shape
    # Split the sublane dim by 8: vreg-aligned, summing over axis 0 is pure
    # VALU adds (no XLU cross-sublane reduce), and the (8, tn) store is a
    # full-tile unmasked store.
    yr = y_f32.reshape(tm // 8, 8, tn)
    psum_ref[0, 0] = jnp.sum(yr, axis=0)
    psq_ref[0, 0] = jnp.sum(yr * yr, axis=0)


def _fused_linear_stats_kernel(
    x_ref, w_ref, b_ref,            # inputs (x/w in bf16, b in f32)
    y_ref, psum_ref, psq_ref,       # outputs
    *scratch,                       # (acc_ref,) when nk > 1, else ()
    single_k,
):
    if single_k:
        y = jnp.dot(x_ref[...], w_ref[...], preferred_element_type=jnp.float32)
        y = y + b_ref[...].astype(jnp.float32)
        y_ref[...] = y.astype(y_ref.dtype)
        _write_partial_stats(y, psum_ref, psq_ref)
    else:
        (acc_ref,) = scratch
        k = pl.program_id(2)
        nk = pl.num_programs(2)

        @pl.when(k == 0)
        def _init_acc():
            acc_ref[...] = jnp.zeros_like(acc_ref)

        acc_ref[...] += jnp.dot(
            x_ref[...], w_ref[...], preferred_element_type=jnp.float32
        )

        @pl.when(k == nk - 1)
        def _finalize_tile():
            # Bias added once per output tile (not per K step).
            y = acc_ref[...] + b_ref[...].astype(jnp.float32)
            y_ref[...] = y.astype(y_ref.dtype)
            _write_partial_stats(y, psum_ref, psq_ref)


def _pick_tile(dim, pref, align):
    """Largest multiple of `align` that divides `dim` and is <= pref."""
    t = min(pref, dim)
    t -= t % align
    t = max(t, align)
    while dim % t != 0:
        t -= align
    return t


def debug_linear_forward(x, w, b, *, tm_pref=512, tn_pref=512, tk_pref=512,
                         compute_dtype=jnp.bfloat16):
    """y = x @ w + b plus Debug-hook statistics, in one fused pallas_call."""
    B, K = x.shape
    K2, N = w.shape
    assert K == K2 and b.shape == (1, N)
    # Lane-dense shapes required (unmasked stores, full MXU tiles).
    # TODO(synk): support ragged B/K/N via zero-padding + row/col masking of
    # the statistics; for now the demo shapes are pre-aligned.
    assert B % 8 == 0 and K % 128 == 0 and N % 128 == 0, (
        "B must be a multiple of 8; K and N multiples of 128")

    tm = _pick_tile(B, tm_pref, 8)
    tn = _pick_tile(N, tn_pref, 128)
    tk = _pick_tile(K, tk_pref, 128)
    nm, nn, nk = B // tm, N // tn, K // tk
    single_k = (nk == 1)

    # bf16 MXU inputs (native dtype on v5e/v6e/v7x), f32 accumulation inside.
    x_c = x.astype(compute_dtype)
    w_c = w.astype(compute_dtype)

    kernel = functools.partial(_fused_linear_stats_kernel, single_k=single_k)

    if single_k:
        grid = (nm, nn)
        in_specs = [
            pl.BlockSpec((tm, K), lambda i, j: (i, 0)),
            pl.BlockSpec((K, tn), lambda i, j: (0, j)),
            pl.BlockSpec((1, tn), lambda i, j: (0, j)),
        ]
        out_specs = (
            pl.BlockSpec((tm, tn), lambda i, j: (i, j)),
            pl.BlockSpec((1, 1, 8, tn), lambda i, j: (i, j, 0, 0)),
            pl.BlockSpec((1, 1, 8, tn), lambda i, j: (i, j, 0, 0)),
        )
        scratch_shapes = []
        semantics = ("parallel", "parallel")
    else:
        grid = (nm, nn, nk)
        in_specs = [
            pl.BlockSpec((tm, tk), lambda i, j, k: (i, k)),
            pl.BlockSpec((tk, tn), lambda i, j, k: (k, j)),
            pl.BlockSpec((1, tn), lambda i, j, k: (0, j)),
        ]
        out_specs = (
            pl.BlockSpec((tm, tn), lambda i, j, k: (i, j)),
            pl.BlockSpec((1, 1, 8, tn), lambda i, j, k: (i, j, 0, 0)),
            pl.BlockSpec((1, 1, 8, tn), lambda i, j, k: (i, j, 0, 0)),
        )
        scratch_shapes = [pltpu.VMEM((tm, tn), jnp.float32)]
        # Cross-tile stats are now outside the kernel -> M/N can run parallel
        # (megacore on v7x); only the K reduction is serialized.
        semantics = ("parallel", "parallel", "arbitrary")

    bytes_accessed = int(
        x_c.size * x_c.dtype.itemsize
        + w_c.size * w_c.dtype.itemsize
        + b.size * b.dtype.itemsize
        + B * N * jnp.dtype(x.dtype).itemsize
        + 2 * nm * nn * 8 * tn * 4
    )
    cost = pl.CostEstimate(flops=2 * B * K * N, transcendentals=0,
                           bytes_accessed=bytes_accessed)

    y, psum, psq = pl.pallas_call(
        kernel,
        out_shape=(
            jax.ShapeDtypeStruct((B, N), x.dtype),
            jax.ShapeDtypeStruct((nm, nn, 8, tn), jnp.float32),
            jax.ShapeDtypeStruct((nm, nn, 8, tn), jnp.float32),
        ),
        grid_spec=pltpu.PrefetchScalarGridSpec(
            num_scalar_prefetch=0,
            grid=grid,
            in_specs=in_specs,
            out_specs=out_specs,
            scratch_shapes=scratch_shapes,
        ),
        compiler_params=pltpu.CompilerParams(
            dimension_semantics=semantics,
            # Explicit budget: large tiles fit comfortably under 32 MiB on all
            # of v5e (16 MiB default), v6e and v7x (32 MiB default, 64 MiB phys).
            vmem_limit_bytes=32 * 1024 * 1024,
        ),
        cost_estimate=cost,
    )(x_c, w_c, b)

    # ---- tiny final reduction of the Debug-hook statistics (plain JAX) -----
    col_sum = jnp.sum(psum, axis=(0, 2)).reshape(-1)   # (N,)
    col_sq = jnp.sum(psq, axis=(0, 2)).reshape(-1)     # (N,)
    mean_all = jnp.sum(col_sum) / (B * N)
    col_mean = col_sum / B
    # Unbiased per-column variance over the batch (single-pass, f32),
    # clamped >= 0 to avoid sqrt(NaN) from cancellation on low-variance cols.
    bm1 = float(B - 1) if B > 1 else float("nan")      # torch: NaN when B == 1
    var = jnp.maximum((col_sq - col_sum * col_mean) / bm1, 0.0)
    std = jnp.sqrt(var)
    std_mean = jnp.mean(std)
    std_std = jnp.std(std, ddof=1)
    stats = jnp.stack([mean_all, std_mean, std_std])
    return y, stats


# ----------------------------------------------------------------------------
# JAX-side equivalent of the Debug wrapper (forward + forward-after hook).
# ----------------------------------------------------------------------------
class DebugPallas:
    DEBUG_ON = True

    def __init__(self, model_fn, name=None):
        self.model_fn = model_fn
        self.name = name if name is not None else type(model_fn).__name__
        self.forwardBeforeInfo = False
        self.forwardAfterInfo = True
        # TODO(synk): register_backward_hook (printBackwardInfo) has no Pallas
        # forward-pass equivalent; autograd hooks are framework side effects.

    def __call__(self, x):
        y, stats = self.model_fn(x)
        if DebugPallas.DEBUG_ON and self.forwardAfterInfo:
            # Async host print (no block_until_ready, keeps dispatch pipelined).
            jax.debug.print(
                "Forward Out  {m} {sm} {ss} " + self.name,
                m=stats[0], sm=stats[1], ss=stats[2],
            )
        return y


if __name__ == "__main__":
    key = jax.random.PRNGKey(0)
    k_x, k_w, k_b = jax.random.split(key, 3)

    # Small but lane-dense shapes (features = multiple of 128, batch = multiple
    # of 8) so stores are unmasked and the MXU tiles are fully occupied.
    B, Hin, Hout = 256, 256, 256

    x = jax.random.normal(k_x, (B, Hin), dtype=jnp.float32)
    # Deterministic Linear parameters (weight stored pre-transposed: (in, out)).
    w = jax.random.normal(k_w, (Hin, Hout), dtype=jnp.float32) * 0.1
    b = jax.random.normal(k_b, (1, Hout), dtype=jnp.float32) * 0.1

    model_fn = functools.partial(debug_linear_forward, w=w, b=b)
    dbg = DebugPallas(model_fn, name="Linear(pallas)")

    y = dbg(x)
    y = jax.block_until_ready(y)

    # ---- reference checks (plain JAX, same bf16-MXU / f32-acc precision) ----
    y_ref = jnp.dot(x.astype(jnp.bfloat16), w.astype(jnp.bfloat16),
                    preferred_element_type=jnp.float32) + b
    assert jnp.allclose(y, y_ref, atol=2e-3, rtol=2e-3), "forward output mismatch"

    _, stats = model_fn(x)
    stats = jax.block_until_ready(stats)
    std_ref = jnp.std(y_ref, axis=0, ddof=1)
    mean_ref = jnp.mean(y_ref)
    std_mean_ref = jnp.mean(std_ref)
    std_std_ref = jnp.std(std_ref, ddof=1)
    assert jnp.allclose(stats[0], mean_ref, atol=2e-3, rtol=2e-3), "mean mismatch"
    assert jnp.allclose(stats[1], std_mean_ref, atol=2e-3, rtol=2e-3), "stdMean mismatch"
    assert jnp.allclose(stats[2], std_std_ref, atol=2e-3, rtol=2e-3), "stdStd mismatch"

    print("KERNEL_OK")
</pallas_src>

<mosaic_0001>
module attributes {stable_mosaic.version = 11 : i64} {
  func.func @_fused_linear_stats_kernel(%arg0: i32, %arg1: i32, %arg2: memref<256x256xbf16, #tpu.memory_space<vmem>>, %arg3: memref<256x256xbf16, #tpu.memory_space<vmem>>, %arg4: memref<1x256xf32, #tpu.memory_space<vmem>>, %arg5: memref<256x256xf32, #tpu.memory_space<vmem>>, %arg6: memref<1x1x8x256xf32, #tpu.memory_space<vmem>>, %arg7: memref<1x1x8x256xf32, #tpu.memory_space<vmem>>) attributes {dimension_semantics = [#tpu.dimension_semantics<parallel>, #tpu.dimension_semantics<parallel>], iteration_bounds = array<i64: 1, 1>, scalar_prefetch = 0 : i64, scratch_operands = 0 : i64, tpu.core_type = #tpu.core_type<tc>, window_params = [{transform_indices = @transform_0, window_bounds = array<i64: 256, 256>}, {transform_indices = @transform_1, window_bounds = array<i64: 256, 256>}, {transform_indices = @transform_2, window_bounds = array<i64: 1, 256>}, {transform_indices = @transform_3, window_bounds = array<i64: 256, 256>}, {transform_indices = @transform_4, window_bounds = array<i64: 1, 1, 8, 256>}, {transform_indices = @transform_5, window_bounds = array<i64: 1, 1, 8, 256>}]} {
    %c0 = arith.constant 0 : index
    %c0_0 = arith.constant 0 : index
    %0 = vector.load %arg2[%c0, %c0_0] : memref<256x256xbf16, #tpu.memory_space<vmem>>, vector<256x256xbf16>
    %c0_1 = arith.constant 0 : index
    %c0_2 = arith.constant 0 : index
    %1 = vector.load %arg3[%c0_1, %c0_2] : memref<256x256xbf16, #tpu.memory_space<vmem>>, vector<256x256xbf16>
    %cst = arith.constant dense<0.000000e+00> : vector<256x256xf32>
    %2 = tpu.matmul %0, %1, %cst {dimension_numbers = #tpu.dot_dimension_numbers<[1], [0], [0], [1], [0, 0, 1, 1], [], []>} : vector<256x256xbf16>, vector<256x256xbf16>, vector<256x256xf32> -> vector<256x256xf32>
    %c0_3 = arith.constant 0 : index
    %c0_4 = arith.constant 0 : index
    %3 = vector.load %arg4[%c0_3, %c0_4] : memref<1x256xf32, #tpu.memory_space<vmem>>, vector<1x256xf32>
    %4 = vector.broadcast %3 : vector<1x256xf32> to vector<256x256xf32>
    %5 = arith.addf %2, %4 : vector<256x256xf32>
    %c0_5 = arith.constant 0 : index
    %c0_6 = arith.constant 0 : index
    %6 = vector.load %arg5[%c0_5, %c0_6] : memref<256x256xf32, #tpu.memory_space<vmem>>, vector<256x256xf32>
    tpu.vector_store %arg5[%c0_5, %c0_6], %5 {strides = array<i32>} : memref<256x256xf32, #tpu.memory_space<vmem>>, vector<256x256xf32>,
    %7 = vector.shape_cast %5 : vector<256x256xf32> to vector<32x8x256xf32>
    %cst_7 = arith.constant dense<0.000000e+00> : vector<8x256xf32>
    %8 = vector.multi_reduction <add>, %7, %cst_7 [0] : vector<32x8x256xf32> to vector<8x256xf32>
    %c0_8 = arith.constant 0 : index
    %c0_9 = arith.constant 0 : index
    %c0_10 = arith.constant 0 : index
    %c0_11 = arith.constant 0 : index
    %9 = vector.load %arg6[%c0_8, %c0_9, %c0_10, %c0_11] : memref<1x1x8x256xf32, #tpu.memory_space<vmem>>, vector<1x1x8x256xf32>
    %10 = vector.shape_cast %9 : vector<1x1x8x256xf32> to vector<8x256xf32>
    %11 = vector.shape_cast %8 : vector<8x256xf32> to vector<1x1x8x256xf32>
    tpu.vector_store %arg6[%c0_8, %c0_9, %c0_10, %c0_11], %11 {strides = array<i32>} : memref<1x1x8x256xf32, #tpu.memory_space<vmem>>, vector<1x1x8x256xf32>,
    %12 = arith.mulf %7, %7 : vector<32x8x256xf32>
    %cst_12 = arith.constant dense<0.000000e+00> : vector<8x256xf32>
    %13 = vector.multi_reduction <add>, %12, %cst_12 [0] : vector<32x8x256xf32> to vector<8x256xf32>
    %c0_13 = arith.constant 0 : index
    %c0_14 = arith.constant 0 : index
    %c0_15 = arith.constant 0 : index
    %c0_16 = arith.constant 0 : index
    %14 = vector.load %arg7[%c0_13, %c0_14, %c0_15, %c0_16] : memref<1x1x8x256xf32, #tpu.memory_space<vmem>>, vector<1x1x8x256xf32>
    %15 = vector.shape_cast %14 : vector<1x1x8x256xf32> to vector<8x256xf32>
    %16 = vector.shape_cast %13 : vector<8x256xf32> to vector<1x1x8x256xf32>
    tpu.vector_store %arg7[%c0_13, %c0_14, %c0_15, %c0_16], %16 {strides = array<i32>} : memref<1x1x8x256xf32, #tpu.memory_space<vmem>>, vector<1x1x8x256xf32>,
    return
  }
  func.func @transform_0(%arg0: i32, %arg1: i32) -> (i32, i32) {
    %c0_i32 = arith.constant 0 : i32
    %c0_i32_0 = arith.constant 0 : i32
    return %arg0, %c0_i32 : i32, i32
  }
  func.func @transform_1(%arg0: i32, %arg1: i32) -> (i32, i32) {
    %c0_i32 = arith.constant 0 : i32
    %c0_i32_0 = arith.constant 0 : i32
    return %c0_i32, %arg1 : i32, i32
  }
  func.func @transform_2(%arg0: i32, %arg1: i32) -> (i32, i32) {
    %c0_i32 = arith.constant 0 : i32
    %c0_i32_0 = arith.constant 0 : i32
    return %c0_i32, %arg1 : i32, i32
  }
  func.func @transform_3(%arg0: i32, %arg1: i32) -> (i32, i32) {
    %c0_i32 = arith.constant 0 : i32
    return %arg0, %arg1 : i32, i32
  }
  func.func @transform_4(%arg0: i32, %arg1: i32) -> (i32, i32, i32, i32) {
    %c0_i32 = arith.constant 0 : i32
    %c0_i32_0 = arith.constant 0 : i32
    %c0_i32_1 = arith.constant 0 : i32
    return %arg0, %arg1, %c0_i32, %c0_i32_0 : i32, i32, i32, i32
  }
  func.func @transform_5(%arg0: i32, %arg1: i32) -> (i32, i32, i32, i32) {
    %c0_i32 = arith.constant 0 : i32
    %c0_i32_0 = arith.constant 0 : i32
    %c0_i32_1 = arith.constant 0 : i32
    return %arg0, %arg1, %c0_i32, %c0_i32_0 : i32, i32, i32, i32
  }
}

</mosaic_0001>

<bundles_post_ra>
// kernel: tpu_custom_call.1
= control target key start
LH: loop header
LB: loop body
LE: loop exit
PB: predicated region body
PF: predicated region fallthrough
CT: control target
= control target key end

     0   :  { %11 = vsyncpa [#allocation3], 0  ;;  %s1625_s0 = inlined_call_operand.hbm [shape: bf16[256,256], index: 0, kind: input, shape index: {}]   ;;  %s1626_s1 = inlined_call_operand.hbm [shape: bf16[256,256], index: 1, kind: input, shape index: {}]   ;;  %s1627_s2 = inlined_call_operand.vmem [shape: f32[1,256], index: 2, kind: input, shape index: {}]   ;;  %s1628_s3 = inlined_call_operand.hbm [shape: f32[256,256], index: 3, kind: output, shape index: {0}]   ;;  %s1629_s4 = inlined_call_operand.hbm [shape: f32[1,1,8,256], index: 4, kind: output, shape index: {1}]   ;;  %s1630_s5 = inlined_call_operand.hbm [shape: f32[1,1,8,256], index: 5, kind: output, shape index: {2}]  }
   0x1   :  { %12 = vsyncpa [#allocation6], 0 }
   0x2   :  { %13 = vsyncpa [#allocation4], 0 }
   0x3   :  { %14 = vsyncpa [#allocation9], 0  ;;  %s1256_s18 = smov [#allocation2]   ;;  %s1138_s22 = scalar_lea.hbm %s1625_s0, 4096 }
   0x4   :  { %s20_s19 = sshll.u32 %s1256_s18, 4  ;;  %p1139_p0 = scmp.ne.s32.totalorder %s1625_s0, %s1138_s22  ;;  %s21_s19 = int_to_ptr.vmem [resolvable:$true] %s20_s19 }
   0x5   :  { %p1142_p1 = scmp.lt.u32.totalorder %s1138_s22, %s1625_s0 }
   0x7   :  { %p1144_p2 = pnand %p1142_p1, %p1139_p0 }
   0x9   :  { %1147 = shalt.err (!%p1144_p2)
}
   0xa   :  { %s1148_s27 = scalar_lea.vmem %s21_s19, 4096  ;;  %p1153_p4 = scmp.lt.s32.totalorder %s21_s19, %s21_s19 }
   0xb   :  { %p1149_p3 = scmp.ne.s32.totalorder %s21_s19, %s1148_s27  ;;  %p1154_p5 = scmp.lt.s32.totalorder %s1148_s27, %s1148_s27 }
   0xd   :  { %p1155_p6 = por %p1154_p5, %p1153_p4 }
   0xf   :  { %p1156_p7 = pnand %p1155_p6, %p1149_p3 }
  0x11   :  { %1159 = shalt.err (!%p1156_p7)
}
  0x12   :  { %s1257_s28 = smov 128   ;;  %s1258_s29 = smov 8  }
  0x13   :  { %26 = dma.hbm_to_vmem [thread:$0]  %s1625_s0, 4096, %s21_s19, [#allocation3], %s1257_s28, %s1257_s28, %s1258_s29  }
  0x14   :  { %s1259_s7 = smov [#allocation5]   ;;  %s1160_s11 = scalar_lea.hbm %s1626_s1, 4096 }
  0x15   :  { %s32_s8 = sshll.u32 %s1259_s7, 4  ;;  %p1161_p8 = scmp.ne.s32.totalorder %s1626_s1, %s1160_s11  ;;  %s33_s8 = int_to_ptr.vmem [resolvable:$true] %s32_s8 }
  0x16   :  { %p1164_p9 = scmp.lt.u32.totalorder %s1160_s11, %s1626_s1 }
  0x18   :  { %p1166_p10 = pnand %p1164_p9, %p1161_p8 }
  0x1a   :  { %1169 = shalt.err (!%p1166_p10)
}
  0x1b   :  { %s1170_s16 = scalar_lea.vmem %s33_s8, 4096  ;;  %p1175_p12 = scmp.lt.s32.totalorder %s33_s8, %s33_s8 }
  0x1c   :  { %p1171_p11 = scmp.ne.s32.totalorder %s33_s8, %s1170_s16  ;;  %p1176_p13 = scmp.lt.s32.totalorder %s1170_s16, %s1170_s16 }
  0x1e   :  { %p1177_p0 = por %p1176_p13, %p1175_p12 }
  0x20   :  { %p1178_p1 = pnand %p1177_p0, %p1171_p11 }
  0x22   :  { %1181 = shalt.err (!%p1178_p1)
}
  0x23   :  { %38 = dma.hbm_to_vmem [thread:$0]  %s1626_s1, 4096, %s33_s8, [#allocation6], %s1257_s28, %s1257_s28, %s1258_s29  }
  0x24   :  { %1248 = dma.done.wait [#allocation3], 4096  }
  0x25   :  { %1249 = vsyncadd [#allocation3], 4294963200 }
  0x26   :  { %1250 = dma.done.wait [#allocation6], 4096  }
  0x27   :  { %1251 = vsyncadd [#allocation6], 4294963200  ;;  %v1042_v0 = vld [vmem:[#allocation5 + $0x4] ss:$8 sps:$4 sm:$0xff]   ;;  %v1044_v1 = vld [vmem:[#allocation5] ss:$8 sps:$4 sm:$0xff]  }
  0x28   :  { %443 = vmatprep.subr.bf16.mxu0 %v1042_v0  ;;  %v1045_v2 = vld [vmem:[#allocation5 + $0x14] ss:$8 sps:$4 sm:$0xff]   ;;  %1001 = vmatprep.subr.bf16.mxu1 %v1042_v0  ;;  %v1047_v3 = vld [vmem:[#allocation5 + $0x10] ss:$8 sps:$4 sm:$0xff]   ;;  %v1048_v4 = vld [vmem:[#allocation5 + $0x24] ss:$8 sps:$4 sm:$0xff]   ;;  %v113_v0 = vlaneseq }
  0x29   :  { %444 = vmatpush1.bf16.msra.mxu0 %v1044_v1  ;;  %1017 = vmatpush1.bf16.msra.mxu1 %v1044_v1  ;;  %v1050_v5 = vld [vmem:[#allocation5 + $0x20] ss:$8 sps:$4 sm:$0xff]   ;;  %v1051_v6 = vld [vmem:[#allocation5 + $0x34] ss:$8 sps:$4 sm:$0xff]   ;;  %v1053_v7 = vld [vmem:[#allocation5 + $0x30] ss:$8 sps:$4 sm:$0xff]  }
  0x2a   :  { %445 = vmatprep.subr.bf16.mxu0 %v1045_v2  ;;  %1002 = vmatprep.subr.bf16.mxu1 %v1045_v2  ;;  %v1054_v8 = vld [vmem:[#allocation5 + $0x44] ss:$8 sps:$4 sm:$0xff]   ;;  %v1056_v9 = vld [vmem:[#allocation5 + $0x40] ss:$8 sps:$4 sm:$0xff]   ;;  %v1057_v10 = vld [vmem:[#allocation5 + $0x54] ss:$8 sps:$4 sm:$0xff]  }
  0x2b   :  { %v1059_v11 = vld [vmem:[#allocation5 + $0x50] ss:$8 sps:$4 sm:$0xff]   ;;  %v1060_v12 = vld [vmem:[#allocation5 + $0x64] ss:$8 sps:$4 sm:$0xff]   ;;  %v1062_v14 = vld [vmem:[#allocation5 + $0x60] ss:$8 sps:$4 sm:$0xff]  }
  0x2c   :  { %v1092_v13 = vld [vmem:[#allocation2 + $0x4] ss:$8 sps:$4 sm:$0xff]   ;;  %v1063_v15 = vld [vmem:[#allocation5 + $0x74] ss:$8 sps:$4 sm:$0xff]   ;;  %v1065_v16 = vld [vmem:[#allocation5 + $0x70] ss:$8 sps:$4 sm:$0xff]  }
  0x2d   :  { %446 = vmatpush1.bf16.msra.mxu0 %v1047_v3  ;;  %1018 = vmatpush1.bf16.msra.mxu1 %v1047_v3  ;;  %v1104_v17 = vld [vmem:[#allocation2 + $0x84] ss:$8 sps:$4 sm:$0xff]   ;;  %v1068_v19 = vld [vmem:[#allocation5 + $0x80] ss:$8 sps:$4 sm:$0xff]   ;;  %v1069_v20 = vld [vmem:[#allocation5 + $0x94] ss:$8 sps:$4 sm:$0xff]  }
  0x2e   :  { %447 = vmatprep.subr.bf16.mxu0 %v1048_v4  ;;  %1003 = vmatprep.subr.bf16.mxu1 %v1048_v4  ;;  %v1066_v18 = vld [vmem:[#allocation5 + $0x84] ss:$8 sps:$4 sm:$0xff]   ;;  %v1071_v21 = vld [vmem:[#allocation5 + $0x90] ss:$8 sps:$4 sm:$0xff]   ;;  %v1074_v23 = vld [vmem:[#allocation5 + $0xa0] ss:$8 sps:$4 sm:$0xff]  }
  0x2f   :  { %475 = vmatprep.mubr.bf16.mxu0 %v1092_v13  ;;  %555 = vmatprep.mubr.bf16.mxu1 %v1104_v17  ;;  %v1072_v22 = vld [vmem:[#allocation5 + $0xa4] ss:$8 sps:$4 sm:$0xff]   ;;  %v1075_v24 = vld [vmem:[#allocation5 + $0xb4] ss:$8 sps:$4 sm:$0xff]   ;;  %v1077_v25 = vld [vmem:[#allocation5 + $0xb0] ss:$8 sps:$4 sm:$0xff]  }
  0x30   :  { %v1078_v26 = vld [vmem:[#allocation5 + $0xc4] ss:$8 sps:$4 sm:$0xff]   ;;  %v1080_v27 = vld [vmem:[#allocation5 + $0xc0] ss:$8 sps:$4 sm:$0xff]   ;;  %v1081_v28 = vld [vmem:[#allocation5 + $0xd4] ss:$8 sps:$4 sm:$0xff]  }
  0x31   :  { %448 = vmatpush1.bf16.msra.mxu0 %v1050_v5  ;;  %1019 = vmatpush1.bf16.msra.mxu1 %v1050_v5  ;;  %v1083_v29 = vld [vmem:[#allocation5 + $0xd0] ss:$8 sps:$4 sm:$0xff]   ;;  %v1084_v30 = vld [vmem:[#allocation5 + $0xe4] ss:$8 sps:$4 sm:$0xff]   ;;  %v1086_v31 = vld [vmem:[#allocation5 + $0xe0] ss:$8 sps:$4 sm:$0xff]  }
  0x32   :  { %449 = vmatprep.subr.bf16.mxu0 %v1051_v6  ;;  %1004 = vmatprep.subr.bf16.mxu1 %v1051_v6  ;;  %v1087_v32 = vld [vmem:[#allocation5 + $0xf4] ss:$8 sps:$4 sm:$0xff]   ;;  %v1089_v33 = vld [vmem:[#allocation5 + $0xf0] ss:$8 sps:$4 sm:$0xff]   ;;  %v1090_v34 = vld [vmem:[#allocation2] ss:$8 sps:$4 sm:$0xff]  }
  0x33   :  { %v1102_v35 = vld [vmem:[#allocation2 + $0x80] ss:$8 sps:$4 sm:$0xff]   ;;  %v1093_v36 = vld [vmem:[#allocation2 + $0x14] ss:$8 sps:$4 sm:$0xff]   ;;  %v1095_v38 = vld [vmem:[#allocation2 + $0x10] ss:$8 sps:$4 sm:$0xff]  }
  0x34   :  { %v1108_v37 = vld [vmem:[#allocation2 + $0x94] ss:$8 sps:$4 sm:$0xff]   ;;  %v1110_v39 = vld [vmem:[#allocation2 + $0x90] ss:$8 sps:$4 sm:$0xff]   ;;  %v1096_v40 = vld [vmem:[#allocation2 + $0x24] ss:$8 sps:$4 sm:$0xff]  }
  0x35   :  { %450 = vmatpush1.bf16.msra.mxu0 %v1053_v7  ;;  %1020 = vmatpush1.bf16.msra.mxu1 %v1053_v7  ;;  %v1114_v41 = vld [vmem:[#allocation2 + $0xa4] ss:$8 sps:$4 sm:$0xff]   ;;  %v1098_v42 = vld [vmem:[#allocation2 + $0x20] ss:$8 sps:$4 sm:$0xff]   ;;  %v1099_v44 = vld [vmem:[#allocation2 + $0x34] ss:$8 sps:$4 sm:$0xff]  }
  0x36   :  { %451 = vmatprep.subr.bf16.mxu0 %v1054_v8  ;;  %1005 = vmatprep.subr.bf16.mxu1 %v1054_v8  ;;  %v1116_v43 = vld [vmem:[#allocation2 + $0xa0] ss:$8 sps:$4 sm:$0xff]   ;;  %v1120_v45 = vld [vmem:[#allocation2 + $0xb4] ss:$8 sps:$4 sm:$0xff]   ;;  %v1101_v46 = vld [vmem:[#allocation2 + $0x30] ss:$8 sps:$4 sm:$0xff]  }
  0x37   :  { %v1122_v47 = vld [vmem:[#allocation2 + $0xb0] ss:$8 sps:$4 sm:$0xff]   ;;  %v1105_v48 = vld [vmem:[#allocation2 + $0x44] ss:$8 sps:$4 sm:$0xff]   ;;  %v1107_v50 = vld [vmem:[#allocation2 + $0x40] ss:$8 sps:$4 sm:$0xff]  }
  0x38   :  { %v1126_v49 = vld [vmem:[#allocation2 + $0xc4] ss:$8 sps:$4 sm:$0xff]   ;;  %v1128_v51 = vld [vmem:[#allocation2 + $0xc0] ss:$8 sps:$4 sm:$0xff]   ;;  %v1111_v52 = vld [vmem:[#allocation2 + $0x54] ss:$8 sps:$4 sm:$0xff]  }
  0x39   :  { %452 = vmatpush1.bf16.msra.mxu0 %v1056_v9  ;;  %1021 = vmatpush1.bf16.msra.mxu1 %v1056_v9  ;;  %v1129_v53 = vld [vmem:[#allocation2 + $0xd4] ss:$8 sps:$4 sm:$0xff]   ;;  %v1113_v54 = vld [vmem:[#allocation2 + $0x50] ss:$8 sps:$4 sm:$0xff]   ;;  %v1117_v56 = vld [vmem:[#allocation2 + $0x64] ss:$8 sps:$4 sm:$0xff]  }
  0x3a   :  { %453 = vmatprep.subr.bf16.mxu0 %v1057_v10  ;;  %1006 = vmatprep.subr.bf16.mxu1 %v1057_v10  ;;  %v1131_v55 = vld [vmem:[#allocation2 + $0xd0] ss:$8 sps:$4 sm:$0xff]   ;;  %v1132_v57 = vld [vmem:[#allocation2 + $0xe4] ss:$8 sps:$4 sm:$0xff]   ;;  %v1119_v58 = vld [vmem:[#allocation2 + $0x60] ss:$8 sps:$4 sm:$0xff]  }
  0x3b   :  { %v1134_v59 = vld [vmem:[#allocation2 + $0xe0] ss:$8 sps:$4 sm:$0xff]   ;;  %v1123_v60 = vld [vmem:[#allocation2 + $0x74] ss:$8 sps:$4 sm:$0xff]   ;;  %v1125_v62 = vld [vmem:[#allocation2 + $0x70] ss:$8 sps:$4 sm:$0xff]  }
  0x3c   :  { %v1135_v61 = vld [vmem:[#allocation2 + $0xf4] ss:$8 sps:$4 sm:$0xff]   ;;  %v1137_v63 = vld [vmem:[#allocation2 + $0xf0] ss:$8 sps:$4 sm:$0xff]   ;;  %v114_v1 = vshrl.u32 %v113_v0, 7 }
  0x3d   :  { %454 = vmatpush1.bf16.msra.mxu0 %v1059_v11  ;;  %1022 = vmatpush1.bf16.msra.mxu1 %v1059_v11  ;;  %v111_v3 = vld [vmem:[%s1627_s2] sm:$0x3]  ;;  %s1260_s2 = smov [#allocation7]  }
  0x3e   :  { %455 = vmatprep.subr.bf16.mxu0 %v1060_v12  ;;  %1007 = vmatprep.subr.bf16.mxu1 %v1060_v12  ;;  %v115_v2 = vsub.s32 0, %v114_v1  ;;  %v119_v4 = vsub.s32 1, %v114_v1  ;;  %s897_s19 = sshll.u32 %s1260_s2, 4  ;;  %s1481_s19 = int_to_ptr.vmem [resolvable:$true] %s897_s19 }
  0x3f   :  { %s1182_s20 = scalar_lea.vmem %s1481_s19, 8192  ;;  %p1187_p3 = scmp.lt.s32.totalorder %s1481_s19, %s1481_s19 }
  0x40   :  { %v1322_v5 = vrot.slane %v111_v3, %v115_v2  ;;  %v1324_v6 = vrot.slane %v111_v3, %v119_v4  ;;  %p1183_p2 = scmp.ne.s32.totalorder %s1481_s19, %s1182_s20  ;;  %p1188_p4 = scmp.lt.s32.totalorder %s1182_s20, %s1182_s20 }
  0x41   :  { %456 = vmatpush1.bf16.msra.mxu0 %v1062_v14  ;;  %1023 = vmatpush1.bf16.msra.mxu1 %v1062_v14 }
  0x42   :  { %457 = vmatprep.subr.bf16.mxu0 %v1063_v15  ;;  %1008 = vmatprep.subr.bf16.mxu1 %v1063_v15  ;;  %p1189_p5 = por %p1188_p4, %p1187_p3 }
  0x44   :  { %p1190_p6 = pnand %p1189_p5, %p1183_p2 }
  0x45   :  { %458 = vmatpush1.bf16.msra.mxu0 %v1065_v16  ;;  %1024 = vmatpush1.bf16.msra.mxu1 %v1065_v16 }
  0x46   :  { %459 = vmatprep.subr.bf16.mxu0 %v1066_v18  ;;  %1009 = vmatprep.subr.bf16.mxu1 %v1066_v18 }
  0x49   :  { %460 = vmatpush1.bf16.msra.mxu0 %v1068_v19  ;;  %1025 = vmatpush1.bf16.msra.mxu1 %v1068_v19 }
  0x4a   :  { %461 = vmatprep.subr.bf16.mxu0 %v1069_v20  ;;  %1010 = vmatprep.subr.bf16.mxu1 %v1069_v20 }
  0x4d   :  { %462 = vmatpush1.bf16.msra.mxu0 %v1071_v21  ;;  %1026 = vmatpush1.bf16.msra.mxu1 %v1071_v21 }
  0x4e   :  { %463 = vmatprep.subr.bf16.mxu0 %v1072_v22  ;;  %1011 = vmatprep.subr.bf16.mxu1 %v1072_v22 }
  0x51   :  { %464 = vmatpush1.bf16.msra.mxu0 %v1074_v23  ;;  %1027 = vmatpush1.bf16.msra.mxu1 %v1074_v23 }
  0x52   :  { %465 = vmatprep.subr.bf16.mxu0 %v1075_v24  ;;  %1012 = vmatprep.subr.bf16.mxu1 %v1075_v24 }
  0x55   :  { %466 = vmatpush1.bf16.msra.mxu0 %v1077_v25  ;;  %1028 = vmatpush1.bf16.msra.mxu1 %v1077_v25 }
  0x56   :  { %467 = vmatprep.subr.bf16.mxu0 %v1078_v26  ;;  %1013 = vmatprep.subr.bf16.mxu1 %v1078_v26 }
  0x59   :  { %468 = vmatpush1.bf16.msra.mxu0 %v1080_v27  ;;  %1029 = vmatpush1.bf16.msra.mxu1 %v1080_v27 }
  0x5a   :  { %469 = vmatprep.subr.bf16.mxu0 %v1081_v28  ;;  %1014 = vmatprep.subr.bf16.mxu1 %v1081_v28 }
  0x5d   :  { %470 = vmatpush1.bf16.msra.mxu0 %v1083_v29  ;;  %1030 = vmatpush1.bf16.msra.mxu1 %v1083_v29 }
  0x5e   :  { %471 = vmatprep.subr.bf16.mxu0 %v1084_v30  ;;  %1015 = vmatprep.subr.bf16.mxu1 %v1084_v30 }
  0x61   :  { %472 = vmatpush1.bf16.msra.mxu0 %v1086_v31  ;;  %1031 = vmatpush1.bf16.msra.mxu1 %v1086_v31 }
  0x62   :  { %473 = vmatprep.subr.bf16.mxu0 %v1087_v32  ;;  %1016 = vmatprep.subr.bf16.mxu1 %v1087_v32 }
  0x65   :  { %474 = vmatpush1.bf16.msra.mxu0 %v1089_v33  ;;  %1032 = vmatpush1.bf16.msra.mxu1 %v1089_v33 }
  0x68   :  { %476 = vmatmul.mubr.bf16.vlgmr.msra.gmra.mrb[0].mxu0 %v1090_v34  ;;  %556 = vmatmul.mubr.bf16.vlgmr.msra.gmra.mrb[0].mxu1 %v1102_v35 }
  0x69   :  { %485 = vmatprep.mubr.bf16.mxu0 %v1093_v36  ;;  %565 = vmatprep.mubr.bf16.mxu1 %v1108_v37 }
  0x70   :  { %486 = vmatmul.mubr.bf16.gmra.mrb[4].mxu0 %v1095_v38  ;;  %566 = vmatmul.mubr.bf16.gmra.mrb[4].mxu1 %v1110_v39 }
  0x71   :  { %495 = vmatprep.mubr.bf16.mxu0 %v1096_v40  ;;  %575 = vmatprep.mubr.bf16.mxu1 %v1114_v41 }
  0x78   :  { %496 = vmatmul.mubr.bf16.gmra.mrb[8].mxu0 %v1098_v42  ;;  %576 = vmatmul.mubr.bf16.gmra.mrb[8].mxu1 %v1116_v43 }
  0x79   :  { %505 = vmatprep.mubr.bf16.mxu0 %v1099_v44  ;;  %585 = vmatprep.mubr.bf16.mxu1 %v1120_v45 }
  0x80   :  { %506 = vmatmul.mubr.bf16.gmra.mrb[12].mxu0 %v1101_v46  ;;  %586 = vmatmul.mubr.bf16.gmra.mrb[12].mxu1 %v1122_v47 }
  0x81   :  { %515 = vmatprep.mubr.bf16.mxu0 %v1105_v48  ;;  %595 = vmatprep.mubr.bf16.mxu1 %v1126_v49 }
  0x88   :  { %516 = vmatmul.mubr.bf16.gmra.mrb[16].mxu0 %v1107_v50  ;;  %596 = vmatmul.mubr.bf16.gmra.mrb[16].mxu1 %v1128_v51 }
  0x89   :  { %525 = vmatprep.mubr.bf16.mxu0 %v1111_v52  ;;  %605 = vmatprep.mubr.bf16.mxu1 %v1129_v53 }
  0x90   :  { %526 = vmatmul.mubr.bf16.gmra.mrb[20].mxu0 %v1113_v54  ;;  %606 = vmatmul.mubr.bf16.gmra.mrb[20].mxu1 %v1131_v55 }
  0x91   :  { %535 = vmatprep.mubr.bf16.mxu0 %v1117_v56  ;;  %615 = vmatprep.mubr.bf16.mxu1 %v1132_v57 }
  0x98   :  { %536 = vmatmul.mubr.bf16.gmra.mrb[24].mxu0 %v1119_v58  ;;  %616 = vmatmul.mubr.bf16.gmra.mrb[24].mxu1 %v1134_v59 }
  0x99   :  { %545 = vmatprep.mubr.bf16.mxu0 %v1123_v60  ;;  %625 = vmatprep.mubr.bf16.mxu1 %v1135_v61 }
  0xa0   :  { %546 = vmatmul.mubr.bf16.gmra.mrb[28].mxu0 %v1125_v62  ;;  %626 = vmatmul.mubr.bf16.gmra.mrb[28].mxu1 %v1137_v63 }
 0x13b   :  { %v477_v7 = vpop.f32.mrb[0].mxu0  ;;  %v557_v8 = vpop.f32.mrb[0].mxu1 }
 0x13c   :  { %v478_v9 = vadd.f32 %v477_v7, %v1322_v5  ;;  %v479_v10 = vpop.f32.mrb[1].mxu0  ;;  %v1328_v11 = vadd.f32 %v557_v8, %v1322_v5  ;;  %v559_v12 = vpop.f32.mrb[1].mxu1 }
 0x13d   :  { %v480_v13 = vadd.f32 %v479_v10, %v1324_v6  ;;  %v481_v14 = vpop.f32.mrb[2].mxu0  ;;  %v1332_v15 = vadd.f32 %v559_v12, %v1324_v6  ;;  %v561_v16 = vpop.f32.mrb[2].mxu1 }
 0x13e   :  { %636 = vst [vmem:[#allocation7] sm:$0xff] %v478_v9  ;;  %v482_v17 = vadd.f32 %v481_v14, %v1322_v5  ;;  %v483_v18 = vpop.f32.mrb[3].mxu0  ;;  %668 = vst [vmem:[#allocation7 + $0x100] sm:$0xff] %v1328_v11  ;;  %v1337_v19 = vadd.f32 %v561_v16, %v1322_v5  ;;  %v563_v20 = vpop.f32.mrb[3].mxu1  ;;  %v764_v23 = vmul.f32 %v478_v9, %v478_v9 }
 0x13f   :  { %637 = vst [vmem:[#allocation7 + $0x8] sm:$0xff] %v480_v13  ;;  %v484_v21 = vadd.f32 %v483_v18, %v1324_v6  ;;  %669 = vst [vmem:[#allocation7 + $0x108] sm:$0xff] %v1332_v15  ;;  %v1342_v22 = vadd.f32 %v563_v20, %v1324_v6  ;;  %v765_v26 = vmul.f32 %v480_v13, %v480_v13 }
 0x140   :  { %638 = vst [vmem:[#allocation7 + $0x10] sm:$0xff] %v482_v17  ;;  %v700_v24 = vadd.f32 %v482_v17, %v478_v9  ;;  %v766_v25 = vmul.f32 %v482_v17, %v482_v17  ;;  %670 = vst [vmem:[#allocation7 + $0x110] sm:$0xff] %v1337_v19 }
 0x141   :  { %639 = vst [vmem:[#allocation7 + $0x18] sm:$0xff] %v484_v21  ;;  %v731_v27 = vadd.f32 %v484_v21, %v480_v13  ;;  %v767_v28 = vmul.f32 %v484_v21, %v484_v21  ;;  %671 = vst [vmem:[#allocation7 + $0x118] sm:$0xff] %v1342_v22 }
 0x142   :  { %v828_v29 = vadd.f32 %v766_v25, %v764_v23 }
 0x143   :  { %v859_v30 = vadd.f32 %v767_v28, %v765_v26  ;;  %v487_v31 = vpop.f32.mrb[4].mxu0  ;;  %v567_v32 = vpop.f32.mrb[4].mxu1 }
 0x144   :  { %v488_v33 = vadd.f32 %v487_v31, %v1322_v5  ;;  %v489_v34 = vpop.f32.mrb[5].mxu0  ;;  %v1348_v35 = vadd.f32 %v567_v32, %v1322_v5  ;;  %v569_v36 = vpop.f32.mrb[5].mxu1 }
 0x145   :  { %v490_v37 = vadd.f32 %v489_v34, %v1324_v6  ;;  %v491_v38 = vpop.f32.mrb[6].mxu0  ;;  %v1352_v39 = vadd.f32 %v569_v36, %v1324_v6  ;;  %v571_v40 = vpop.f32.mrb[6].mxu1 }
 0x146   :  { %640 = vst [vmem:[#allocation7 + $0x20] sm:$0xff] %v488_v33  ;;  %v701_v41 = vadd.f32 %v700_v24, %v488_v33  ;;  %v768_v42 = vmul.f32 %v488_v33, %v488_v33  ;;  %v492_v43 = vadd.f32 %v491_v38, %v1322_v5  ;;  %v493_v44 = vpop.f32.mrb[7].mxu0  ;;  %672 = vst [vmem:[#allocation7 + $0x120] sm:$0xff] %v1348_v35  ;;  %v573_v45 = vpop.f32.mrb[7].mxu1 }
 0x147   :  { %641 = vst [vmem:[#allocation7 + $0x28] sm:$0xff] %v490_v37  ;;  %v732_v46 = vadd.f32 %v731_v27, %v490_v37  ;;  %v769_v47 = vmul.f32 %v490_v37, %v490_v37  ;;  %v494_v48 = vadd.f32 %v493_v44, %v1324_v6  ;;  %673 = vst [vmem:[#allocation7 + $0x128] sm:$0xff] %v1352_v39 }
 0x148   :  { %v829_v49 = vadd.f32 %v828_v29, %v768_v42  ;;  %642 = vst [vmem:[#allocation7 + $0x30] sm:$0xff] %v492_v43  ;;  %v702_v50 = vadd.f32 %v701_v41, %v492_v43  ;;  %v770_v51 = vmul.f32 %v492_v43, %v492_v43  ;;  %v1359_v52 = vadd.f32 %v571_v40, %v1322_v5 }
 0x149   :  { %v860_v53 = vadd.f32 %v859_v30, %v769_v47  ;;  %643 = vst [vmem:[#allocation7 + $0x38] sm:$0xff] %v494_v48  ;;  %v733_v54 = vadd.f32 %v732_v46, %v494_v48  ;;  %v771_v55 = vmul.f32 %v494_v48, %v494_v48  ;;  %v1362_v56 = vadd.f32 %v573_v45, %v1324_v6 }
 0x14a   :  { %v830_v57 = vadd.f32 %v829_v49, %v770_v51  ;;  %674 = vst [vmem:[#allocation7 + $0x130] sm:$0xff] %v1359_v52 }
 0x14b   :  { %v861_v58 = vadd.f32 %v860_v53, %v771_v55  ;;  %v497_v59 = vpop.f32.mrb[8].mxu0  ;;  %675 = vst [vmem:[#allocation7 + $0x138] sm:$0xff] %v1362_v56  ;;  %v577_v60 = vpop.f32.mrb[8].mxu1 }
 0x14c   :  { %v498_v61 = vadd.f32 %v497_v59, %v1322_v5  ;;  %v499_v62 = vpop.f32.mrb[9].mxu0  ;;  %v1368_v63 = vadd.f32 %v577_v60, %v1322_v5  ;;  %v579_v0 = vpop.f32.mrb[9].mxu1 }
 0x14d   :  { %v500_v1 = vadd.f32 %v499_v62, %v1324_v6  ;;  %v501_v2 = vpop.f32.mrb[10].mxu0  ;;  %v1372_v3 = vadd.f32 %v579_v0, %v1324_v6  ;;  %v581_v4 = vpop.f32.mrb[10].mxu1 }
 0x14e   :  { %644 = vst [vmem:[#allocation7 + $0x40] sm:$0xff] %v498_v61  ;;  %v703_v7 = vadd.f32 %v702_v50, %v498_v61  ;;  %v772_v8 = vmul.f32 %v498_v61, %v498_v61  ;;  %v502_v9 = vadd.f32 %v501_v2, %v1322_v5  ;;  %v503_v10 = vpop.f32.mrb[11].mxu0  ;;  %676 = vst [vmem:[#allocation7 + $0x140] sm:$0xff] %v1368_v63  ;;  %v583_v12 = vpop.f32.mrb[11].mxu1 }
 0x14f   :  { %645 = vst [vmem:[#allocation7 + $0x48] sm:$0xff] %v500_v1  ;;  %v734_v13 = vadd.f32 %v733_v54, %v500_v1  ;;  %v773_v14 = vmul.f32 %v500_v1, %v500_v1  ;;  %v504_v16 = vadd.f32 %v503_v10, %v1324_v6  ;;  %677 = vst [vmem:[#allocation7 + $0x148] sm:$0xff] %v1372_v3 }
 0x150   :  { %v831_v17 = vadd.f32 %v830_v57, %v772_v8  ;;  %646 = vst [vmem:[#allocation7 + $0x50] sm:$0xff] %v502_v9  ;;  %v704_v18 = vadd.f32 %v703_v7, %v502_v9  ;;  %v774_v20 = vmul.f32 %v502_v9, %v502_v9  ;;  %v1379_v21 = vadd.f32 %v581_v4, %v1322_v5 }
 0x151   :  { %v862_v23 = vadd.f32 %v861_v58, %v773_v14  ;;  %647 = vst [vmem:[#allocation7 + $0x58] sm:$0xff] %v504_v16  ;;  %v735_v24 = vadd.f32 %v734_v13, %v504_v16  ;;  %v775_v25 = vmul.f32 %v504_v16, %v504_v16  ;;  %v1382_v26 = vadd.f32 %v583_v12, %v1324_v6 }
 0x152   :  { %v832_v27 = vadd.f32 %v831_v17, %v774_v20  ;;  %678 = vst [vmem:[#allocation7 + $0x150] sm:$0xff] %v1379_v21 }
 0x153   :  { %v863_v28 = vadd.f32 %v862_v23, %v775_v25  ;;  %v507_v29 = vpop.f32.mrb[12].mxu0  ;;  %679 = vst [vmem:[#allocation7 + $0x158] sm:$0xff] %v1382_v26  ;;  %v587_v30 = vpop.f32.mrb[12].mxu1 }
 0x154   :  { %v508_v31 = vadd.f32 %v507_v29, %v1322_v5  ;;  %v509_v32 = vpop.f32.mrb[13].mxu0  ;;  %v1388_v33 = vadd.f32 %v587_v30, %v1322_v5  ;;  %v589_v34 = vpop.f32.mrb[13].mxu1 }
 0x155   :  { %v510_v36 = vadd.f32 %v509_v32, %v1324_v6  ;;  %v511_v37 = vpop.f32.mrb[14].mxu0  ;;  %v1392_v38 = vadd.f32 %v589_v34, %v1324_v6  ;;  %v591_v40 = vpop.f32.mrb[14].mxu1 }
 0x156   :  { %648 = vst [vmem:[#allocation7 + $0x60] sm:$0xff] %v508_v31  ;;  %v705_v41 = vadd.f32 %v704_v18, %v508_v31  ;;  %v776_v42 = vmul.f32 %v508_v31, %v508_v31  ;;  %v512_v43 = vadd.f32 %v511_v37, %v1322_v5  ;;  %v513_v44 = vpop.f32.mrb[15].mxu0  ;;  %680 = vst [vmem:[#allocation7 + $0x160] sm:$0xff] %v1388_v33  ;;  %v593_v45 = vpop.f32.mrb[15].mxu1 }
 0x157   :  { %649 = vst [vmem:[#allocation7 + $0x68] sm:$0xff] %v510_v36  ;;  %v736_v46 = vadd.f32 %v735_v24, %v510_v36  ;;  %v777_v47 = vmul.f32 %v510_v36, %v510_v36  ;;  %v514_v48 = vadd.f32 %v513_v44, %v1324_v6  ;;  %681 = vst [vmem:[#allocation7 + $0x168] sm:$0xff] %v1392_v38 }
 0x158   :  { %v833_v49 = vadd.f32 %v832_v27, %v776_v42  ;;  %650 = vst [vmem:[#allocation7 + $0x70] sm:$0xff] %v512_v43  ;;  %v706_v50 = vadd.f32 %v705_v41, %v512_v43  ;;  %v778_v51 = vmul.f32 %v512_v43, %v512_v43  ;;  %v1399_v53 = vadd.f32 %v591_v40, %v1322_v5 }
 0x159   :  { %v864_v54 = vadd.f32 %v863_v28, %v777_v47  ;;  %651 = vst [vmem:[#allocation7 + $0x78] sm:$0xff] %v514_v48  ;;  %v737_v55 = vadd.f32 %v736_v46, %v514_v48  ;;  %v779_v57 = vmul.f32 %v514_v48, %v514_v48  ;;  %v1402_v58 = vadd.f32 %v593_v45, %v1324_v6 }
 0x15a   :  { %v834_v59 = vadd.f32 %v833_v49, %v778_v51  ;;  %682 = vst [vmem:[#allocation7 + $0x170] sm:$0xff] %v1399_v53 }
 0x15b   :  { %v865_v60 = vadd.f32 %v864_v54, %v779_v57  ;;  %v517_v61 = vpop.f32.mrb[16].mxu0  ;;  %683 = vst [vmem:[#allocation7 + $0x178] sm:$0xff] %v1402_v58  ;;  %v597_v62 = vpop.f32.mrb[16].mxu1 }
 0x15c   :  { %v518_v0 = vadd.f32 %v517_v61, %v1322_v5  ;;  %v519_v1 = vpop.f32.mrb[17].mxu0  ;;  %v1408_v2 = vadd.f32 %v597_v62, %v1322_v5  ;;  %v599_v4 = vpop.f32.mrb[17].mxu1 }
 0x15d   :  { %v520_v7 = vadd.f32 %v519_v1, %v1324_v6  ;;  %v521_v8 = vpop.f32.mrb[18].mxu0  ;;  %v1412_v9 = vadd.f32 %v599_v4, %v1324_v6  ;;  %v601_v10 = vpop.f32.mrb[18].mxu1 }
 0x15e   :  { %652 = vst [vmem:[#allocation7 + $0x80] sm:$0xff] %v518_v0  ;;  %v707_v12 = vadd.f32 %v706_v50, %v518_v0  ;;  %v780_v13 = vmul.f32 %v518_v0, %v518_v0  ;;  %v522_v14 = vadd.f32 %v521_v8, %v1322_v5  ;;  %v523_v16 = vpop.f32.mrb[19].mxu0  ;;  %684 = vst [vmem:[#allocation7 + $0x180] sm:$0xff] %v1408_v2  ;;  %v603_v17 = vpop.f32.mrb[19].mxu1 }
 0x15f   :  { %653 = vst [vmem:[#allocation7 + $0x88] sm:$0xff] %v520_v7  ;;  %v738_v18 = vadd.f32 %v737_v55, %v520_v7  ;;  %v781_v20 = vmul.f32 %v520_v7, %v520_v7  ;;  %v524_v23 = vadd.f32 %v523_v16, %v1324_v6  ;;  %685 = vst [vmem:[#allocation7 + $0x188] sm:$0xff] %v1412_v9 }
 0x160   :  { %v835_v24 = vadd.f32 %v834_v59, %v780_v13  ;;  %654 = vst [vmem:[#allocation7 + $0x90] sm:$0xff] %v522_v14  ;;  %v708_v25 = vadd.f32 %v707_v12, %v522_v14  ;;  %v782_v27 = vmul.f32 %v522_v14, %v522_v14  ;;  %v1419_v28 = vadd.f32 %v601_v10, %v1322_v5 }
 0x161   :  { %v866_v29 = vadd.f32 %v865_v60, %v781_v20  ;;  %655 = vst [vmem:[#allocation7 + $0x98] sm:$0xff] %v524_v23  ;;  %v739_v30 = vadd.f32 %v738_v18, %v524_v23  ;;  %v783_v31 = vmul.f32 %v524_v23, %v524_v23  ;;  %v1422_v32 = vadd.f32 %v603_v17, %v1324_v6 }
 0x162   :  { %v836_v34 = vadd.f32 %v835_v24, %v782_v27  ;;  %686 = vst [vmem:[#allocation7 + $0x190] sm:$0xff] %v1419_v28 }
 0x163   :  { %v867_v36 = vadd.f32 %v866_v29, %v783_v31  ;;  %v527_v37 = vpop.f32.mrb[20].mxu0  ;;  %687 = vst [vmem:[#allocation7 + $0x198] sm:$0xff] %v1422_v32  ;;  %v607_v40 = vpop.f32.mrb[20].mxu1 }
 0x164   :  { %v528_v41 = vadd.f32 %v527_v37, %v1322_v5  ;;  %v529_v42 = vpop.f32.mrb[21].mxu0  ;;  %v1428_v43 = vadd.f32 %v607_v40, %v1322_v5  ;;  %v609_v44 = vpop.f32.mrb[21].mxu1 }
 0x165   :  { %v530_v45 = vadd.f32 %v529_v42, %v1324_v6  ;;  %v531_v46 = vpop.f32.mrb[22].mxu0  ;;  %v1432_v47 = vadd.f32 %v609_v44, %v1324_v6  ;;  %v611_v48 = vpop.f32.mrb[22].mxu1 }
 0x166   :  { %656 = vst [vmem:[#allocation7 + $0xa0] sm:$0xff] %v528_v41  ;;  %v709_v49 = vadd.f32 %v708_v25, %v528_v41  ;;  %v784_v50 = vmul.f32 %v528_v41, %v528_v41  ;;  %v532_v51 = vadd.f32 %v531_v46, %v1322_v5  ;;  %v533_v54 = vpop.f32.mrb[23].mxu0  ;;  %688 = vst [vmem:[#allocation7 + $0x1a0] sm:$0xff] %v1428_v43  ;;  %v613_v55 = vpop.f32.mrb[23].mxu1 }
 0x167   :  { %657 = vst [vmem:[#allocation7 + $0xa8] sm:$0xff] %v530_v45  ;;  %v740_v57 = vadd.f32 %v739_v30, %v530_v45  ;;  %v785_v59 = vmul.f32 %v530_v45, %v530_v45  ;;  %v534_v60 = vadd.f32 %v533_v54, %v1324_v6  ;;  %689 = vst [vmem:[#allocation7 + $0x1a8] sm:$0xff] %v1432_v47 }
 0x168   :  { %v837_v61 = vadd.f32 %v836_v34, %v784_v50  ;;  %658 = vst [vmem:[#allocation7 + $0xb0] sm:$0xff] %v532_v51  ;;  %v710_v62 = vadd.f32 %v709_v49, %v532_v51  ;;  %v786_v0 = vmul.f32 %v532_v51, %v532_v51  ;;  %v1439_v1 = vadd.f32 %v611_v48, %v1322_v5 }
 0x169   :  { %v868_v4 = vadd.f32 %v867_v36, %v785_v59  ;;  %659 = vst [vmem:[#allocation7 + $0xb8] sm:$0xff] %v534_v60  ;;  %v741_v7 = vadd.f32 %v740_v57, %v534_v60  ;;  %v787_v8 = vmul.f32 %v534_v60, %v534_v60  ;;  %v1442_v10 = vadd.f32 %v613_v55, %v1324_v6 }
 0x16a   :  { %v838_v12 = vadd.f32 %v837_v61, %v786_v0  ;;  %690 = vst [vmem:[#allocation7 + $0x1b0] sm:$0xff] %v1439_v1 }
 0x16b   :  { %v869_v13 = vadd.f32 %v868_v4, %v787_v8  ;;  %v537_v14 = vpop.f32.mrb[24].mxu0  ;;  %691 = vst [vmem:[#allocation7 + $0x1b8] sm:$0xff] %v1442_v10  ;;  %v617_v16 = vpop.f32.mrb[24].mxu1 }
 0x16c   :  { %v538_v17 = vadd.f32 %v537_v14, %v1322_v5  ;;  %v539_v18 = vpop.f32.mrb[25].mxu0  ;;  %v1448_v20 = vadd.f32 %v617_v16, %v1322_v5  ;;  %v619_v23 = vpop.f32.mrb[25].mxu1 }
 0x16d   :  { %v540_v24 = vadd.f32 %v539_v18, %v1324_v6  ;;  %v541_v25 = vpop.f32.mrb[26].mxu0  ;;  %v1452_v27 = vadd.f32 %v619_v23, %v1324_v6  ;;  %v621_v29 = vpop.f32.mrb[26].mxu1 }
 0x16e   :  { %660 = vst [vmem:[#allocation7 + $0xc0] sm:$0xff] %v538_v17  ;;  %v711_v30 = vadd.f32 %v710_v62, %v538_v17  ;;  %v788_v31 = vmul.f32 %v538_v17, %v538_v17  ;;  %v542_v34 = vadd.f32 %v541_v25, %v1322_v5  ;;  %v543_v36 = vpop.f32.mrb[27].mxu0  ;;  %692 = vst [vmem:[#allocation7 + $0x1c0] sm:$0xff] %v1448_v20  ;;  %v623_v37 = vpop.f32.mrb[27].mxu1 }
 0x16f   :  { %661 = vst [vmem:[#allocation7 + $0xc8] sm:$0xff] %v540_v24  ;;  %v742_v40 = vadd.f32 %v741_v7, %v540_v24  ;;  %v789_v41 = vmul.f32 %v540_v24, %v540_v24  ;;  %v544_v42 = vadd.f32 %v543_v36, %v1324_v6  ;;  %693 = vst [vmem:[#allocation7 + $0x1c8] sm:$0xff] %v1452_v27 }
 0x170   :  { %v839_v44 = vadd.f32 %v838_v12, %v788_v31  ;;  %662 = vst [vmem:[#allocation7 + $0xd0] sm:$0xff] %v542_v34  ;;  %v712_v45 = vadd.f32 %v711_v30, %v542_v34  ;;  %v790_v46 = vmul.f32 %v542_v34, %v542_v34  ;;  %v1459_v48 = vadd.f32 %v621_v29, %v1322_v5 }
 0x171   :  { %v870_v49 = vadd.f32 %v869_v13, %v789_v41  ;;  %663 = vst [vmem:[#allocation7 + $0xd8] sm:$0xff] %v544_v42  ;;  %v743_v50 = vadd.f32 %v742_v40, %v544_v42  ;;  %v791_v51 = vmul.f32 %v544_v42, %v544_v42  ;;  %v1462_v54 = vadd.f32 %v623_v37, %v1324_v6 }
 0x172   :  { %v840_v55 = vadd.f32 %v839_v44, %v790_v46  ;;  %694 = vst [vmem:[#allocation7 + $0x1d0] sm:$0xff] %v1459_v48  ;;  %v796_v44 = vmul.f32 %v1328_v11, %v1328_v11 }
 0x173   :  { %v871_v57 = vadd.f32 %v870_v49, %v791_v51  ;;  %v547_v59 = vpop.f32.mrb[28].mxu0  ;;  %695 = vst [vmem:[#allocation7 + $0x1d8] sm:$0xff] %v1462_v54  ;;  %v627_v60 = vpop.f32.mrb[28].mxu1 }
 0x174   :  { %v548_v61 = vadd.f32 %v547_v59, %v1322_v5  ;;  %v549_v62 = vpop.f32.mrb[29].mxu0  ;;  %v1468_v0 = vadd.f32 %v627_v60, %v1322_v5  ;;  %v629_v4 = vpop.f32.mrb[29].mxu1 }
 0x175   :  { %v550_v7 = vadd.f32 %v549_v62, %v1324_v6  ;;  %v551_v8 = vpop.f32.mrb[30].mxu0  ;;  %v1472_v12 = vadd.f32 %v629_v4, %v1324_v6  ;;  %v631_v13 = vpop.f32.mrb[30].mxu1 }
 0x176   :  { %664 = vst [vmem:[#allocation7 + $0xe0] sm:$0xff] %v548_v61  ;;  %v713_v14 = vadd.f32 %v712_v45, %v548_v61  ;;  %v792_v16 = vmul.f32 %v548_v61, %v548_v61  ;;  %v552_v17 = vadd.f32 %v551_v8, %v1322_v5  ;;  %v553_v18 = vpop.f32.mrb[31].mxu0  ;;  %696 = vst [vmem:[#allocation7 + $0x1e0] sm:$0xff] %v1468_v0  ;;  %v633_v23 = vpop.f32.mrb[31].mxu1 }
 0x177   :  { %665 = vst [vmem:[#allocation7 + $0xe8] sm:$0xff] %v550_v7  ;;  %v744_v24 = vadd.f32 %v743_v50, %v550_v7  ;;  %v793_v25 = vmul.f32 %v550_v7, %v550_v7  ;;  %v554_v29 = vadd.f32 %v553_v18, %v1324_v6  ;;  %697 = vst [vmem:[#allocation7 + $0x1e8] sm:$0xff] %v1472_v12 }
 0x178   :  { %v841_v30 = vadd.f32 %v840_v55, %v792_v16  ;;  %666 = vst [vmem:[#allocation7 + $0xf0] sm:$0xff] %v552_v17  ;;  %v714_v31 = vadd.f32 %v713_v14, %v552_v17  ;;  %v794_v34 = vmul.f32 %v552_v17, %v552_v17  ;;  %v1479_v36 = vadd.f32 %v631_v13, %v1322_v5 }
 0x179   :  { %v872_v37 = vadd.f32 %v871_v57, %v793_v25  ;;  %667 = vst [vmem:[#allocation7 + $0xf8] sm:$0xff] %v554_v29  ;;  %v745_v40 = vadd.f32 %v744_v24, %v554_v29  ;;  %v795_v41 = vmul.f32 %v554_v29, %v554_v29  ;;  %v1484_v42 = vadd.f32 %v633_v23, %v1324_v6 }
 0x17a   :  { %v715_v45 = vadd.f32 %v714_v31, %v1328_v11  ;;  %v842_v46 = vadd.f32 %v841_v30, %v794_v34  ;;  %698 = vst [vmem:[#allocation7 + $0x1f0] sm:$0xff] %v1479_v36  ;;  %v797_v5 = vmul.f32 %v1332_v15, %v1332_v15  ;;  %v798_v6 = vmul.f32 %v1337_v19, %v1337_v19 }
 0x17b   :  { %v746_v49 = vadd.f32 %v745_v40, %v1332_v15  ;;  %v873_v50 = vadd.f32 %v872_v37, %v795_v41  ;;  %699 = vst [vmem:[#allocation7 + $0x1f8] sm:$0xff] %v1484_v42 }
 0x17c   :  { %v716_v51 = vadd.f32 %v715_v45, %v1337_v19  ;;  %v843_v55 = vadd.f32 %v842_v46, %v796_v44 }
 0x17d   :  { %1193 = shalt.err (!%p1190_p6)
}
 0x17e   :  { %s1194_s23 = scalar_lea.hbm %s1628_s3, 8192 }
 0x17f   :  { %p1195_p7 = scmp.ne.s32.totalorder %s1628_s3, %s1194_s23  ;;  %p1198_p8 = scmp.lt.u32.totalorder %s1194_s23, %s1628_s3 }
 0x181   :  { %p1200_p9 = pnand %p1198_p8, %p1195_p7 }
 0x183   :  { %1203 = shalt.err (!%p1200_p9)
}
 0x184   :  { %s1261_s28 = smov 256   ;;  %s1262_s29 = smov 16   ;;  %v799_v11 = vmul.f32 %v1342_v22, %v1342_v22  ;;  %v747_v15 = vadd.f32 %v746_v49, %v1342_v22  ;;  %v874_v19 = vadd.f32 %v873_v50, %v797_v5  ;;  %v800_v57 = vmul.f32 %v1348_v35, %v1348_v35 }
 0x185   :  { %903 = dma.vmem_to_hbm [thread:$0]  %s1481_s19, 8192, %s1628_s3, [#allocation4], %s1261_s28, %s1261_s28, %s1262_s29   ;;  %v717_v59 = vadd.f32 %v716_v51, %v1348_v35  ;;  %v844_v60 = vadd.f32 %v843_v55, %v798_v6  ;;  %v801_v61 = vmul.f32 %v1352_v39, %v1352_v39  ;;  %v802_v7 = vmul.f32 %v1359_v52, %v1359_v52 }
 0x186   :  { %v748_v62 = vadd.f32 %v747_v15, %v1352_v39  ;;  %v875_v4 = vadd.f32 %v874_v19, %v799_v11  ;;  %v803_v22 = vmul.f32 %v1362_v56, %v1362_v56  ;;  %v804_v35 = vmul.f32 %v1368_v63, %v1368_v63  ;;  %s1263_s3 = smov [#allocation8]   ;;  %s1264_s8 = smov [#allocation10]  }
 0x187   :  { %v718_v8 = vadd.f32 %v717_v59, %v1359_v52  ;;  %v845_v13 = vadd.f32 %v844_v60, %v800_v57  ;;  %v805_v39 = vmul.f32 %v1372_v3, %v1372_v3  ;;  %v806_v52 = vmul.f32 %v1379_v21, %v1379_v21  ;;  %s910_s7 = sshll.u32 %s1263_s3, 4  ;;  %s920_s9 = sshll.u32 %s1264_s8, 4  ;;  %s911_s7 = int_to_ptr.vmem [resolvable:$true] %s910_s7  ;;  %s921_s9 = int_to_ptr.vmem [resolvable:$true] %s920_s9 }
 0x188   :  { %v749_v14 = vadd.f32 %v748_v62, %v1362_v56  ;;  %v876_v16 = vadd.f32 %v875_v4, %v801_v61  ;;  %v807_v56 = vmul.f32 %v1382_v26, %v1382_v26  ;;  %v812_v49 = vmul.f32 %v1408_v2, %v1408_v2  ;;  %s1204_s10 = scalar_lea.vmem %s911_s7, 256  ;;  %p1209_p11 = scmp.lt.s32.totalorder %s911_s7, %s911_s7 }
 0x189   :  { %v846_v17 = vadd.f32 %v845_v13, %v802_v7  ;;  %v719_v18 = vadd.f32 %v718_v8, %v1368_v63  ;;  %v808_v63 = vmul.f32 %v1388_v33, %v1388_v33  ;;  %v813_v6 = vmul.f32 %v1412_v9, %v1412_v9  ;;  %p1205_p10 = scmp.ne.s32.totalorder %s911_s7, %s1204_s10  ;;  %p1210_p12 = scmp.lt.s32.totalorder %s1204_s10, %s1204_s10 }
 0x18a   :  { %v877_v23 = vadd.f32 %v876_v16, %v803_v22  ;;  %v750_v24 = vadd.f32 %v749_v14, %v1372_v3  ;;  %v809_v3 = vmul.f32 %v1392_v38, %v1392_v38  ;;  %v814_v11 = vmul.f32 %v1419_v28, %v1419_v28 }
 0x18b   :  { %v720_v25 = vadd.f32 %v719_v18, %v1379_v21  ;;  %v847_v29 = vadd.f32 %v846_v17, %v804_v35  ;;  %v810_v21 = vmul.f32 %v1399_v53, %v1399_v53  ;;  %v815_v19 = vmul.f32 %v1422_v32, %v1422_v32  ;;  %p1211_p13 = por %p1210_p12, %p1209_p11 }
 0x18c   :  { %v751_v30 = vadd.f32 %v750_v24, %v1382_v26  ;;  %v878_v31 = vadd.f32 %v877_v23, %v805_v39  ;;  %v811_v26 = vmul.f32 %v1402_v58, %v1402_v58  ;;  %v816_v59 = vmul.f32 %v1428_v43, %v1428_v43 }
 0x18d   :  { %v721_v34 = vadd.f32 %v720_v25, %v1388_v33  ;;  %v848_v37 = vadd.f32 %v847_v29, %v806_v52  ;;  %v817_v61 = vmul.f32 %v1432_v47, %v1432_v47  ;;  %v818_v4 = vmul.f32 %v1439_v1, %v1439_v1  ;;  %p1212_p0 = pnand %p1211_p13, %p1205_p10 }
 0x18e   :  { %v752_v40 = vadd.f32 %v751_v30, %v1392_v38  ;;  %v879_v41 = vadd.f32 %v878_v31, %v807_v56  ;;  %v819_v8 = vmul.f32 %v1442_v10, %v1442_v10  ;;  %v820_v22 = vmul.f32 %v1448_v20, %v1448_v20 }
 0x18f   :  { %v722_v44 = vadd.f32 %v721_v34, %v1399_v53  ;;  %v849_v45 = vadd.f32 %v848_v37, %v808_v63  ;;  %v821_v16 = vmul.f32 %v1452_v27, %v1452_v27  ;;  %v822_v17 = vmul.f32 %v1459_v48, %v1459_v48 }
 0x190   :  { %v753_v46 = vadd.f32 %v752_v40, %v1402_v58  ;;  %v880_v5 = vadd.f32 %v879_v41, %v809_v3  ;;  %v825_v23 = vmul.f32 %v1472_v12, %v1472_v12  ;;  %v826_v56 = vmul.f32 %v1479_v36, %v1479_v36 }
 0x191   :  { %v723_v33 = vadd.f32 %v722_v44, %v1408_v2  ;;  %v850_v50 = vadd.f32 %v849_v45, %v810_v21  ;;  %v827_v31 = vmul.f32 %v1484_v42, %v1484_v42 }
 0x192   :  { %v754_v38 = vadd.f32 %v753_v46, %v1412_v9  ;;  %v881_v51 = vadd.f32 %v880_v5, %v811_v26 }
 0x193   :  { %v851_v53 = vadd.f32 %v850_v50, %v812_v49  ;;  %v724_v55 = vadd.f32 %v723_v33, %v1419_v28 }
 0x194   :  { %v882_v58 = vadd.f32 %v881_v51, %v813_v6  ;;  %v755_v15 = vadd.f32 %v754_v38, %v1422_v32 }
 0x195   :  { %v852_v2 = vadd.f32 %v851_v53, %v814_v11  ;;  %v725_v57 = vadd.f32 %v724_v55, %v1428_v43 }
 0x196   :  { %v883_v9 = vadd.f32 %v882_v58, %v815_v19  ;;  %v756_v60 = vadd.f32 %v755_v15, %v1432_v47 }
 0x197   :  { %v853_v62 = vadd.f32 %v852_v2, %v816_v59  ;;  %v726_v28 = vadd.f32 %v725_v57, %v1439_v1 }
 0x198   :  { %v884_v7 = vadd.f32 %v883_v9, %v817_v61  ;;  %v757_v32 = vadd.f32 %v756_v60, %v1442_v10  ;;  %v824_v10 = vmul.f32 %v1468_v0, %v1468_v0 }
 0x199   :  { %v854_v13 = vadd.f32 %v853_v62, %v818_v4  ;;  %v727_v43 = vadd.f32 %v726_v28, %v1448_v20  ;;  %v823_v20 = vmul.f32 %v1462_v54, %v1462_v54 }
 0x19a   :  { %v885_v14 = vadd.f32 %v884_v7, %v819_v8  ;;  %v758_v47 = vadd.f32 %v757_v32, %v1452_v27 }
 0x19b   :  { %v855_v35 = vadd.f32 %v854_v13, %v820_v22  ;;  %v728_v1 = vadd.f32 %v727_v43, %v1459_v48 }
 0x19c   :  { %v886_v18 = vadd.f32 %v885_v14, %v821_v16  ;;  %v759_v39 = vadd.f32 %v758_v47, %v1462_v54 }
 0x19d   :  { %v856_v24 = vadd.f32 %v855_v35, %v822_v17  ;;  %v729_v27 = vadd.f32 %v728_v1, %v1468_v0 }
 0x19e   :  { %v887_v52 = vadd.f32 %v886_v18, %v823_v20  ;;  %v760_v48 = vadd.f32 %v759_v39, %v1472_v12 }
 0x19f   :  { %v857_v25 = vadd.f32 %v856_v24, %v824_v10  ;;  %v730_v29 = vadd.f32 %v729_v27, %v1479_v36 }
 0x1a0   :  { %v888_v54 = vadd.f32 %v887_v52, %v825_v23  ;;  %v761_v30 = vadd.f32 %v760_v48, %v1484_v42 }
 0x1a1   :  { %v858_v0 = vadd.f32 %v857_v25, %v826_v56  ;;  %762 = vst [vmem:[#allocation8] sm:$0xff] %v730_v29 }
 0x1a2   :  { %v889_v63 = vadd.f32 %v888_v54, %v827_v31  ;;  %763 = vst [vmem:[#allocation8 + $0x8] sm:$0xff] %v761_v30 }
 0x1a3   :  { %890 = vst [vmem:[#allocation10] sm:$0xff] %v858_v0 }
 0x1a4   :  { %1215 = shalt.err (!%p1212_p0)
}
 0x1a5   :  { %s1216_s13 = scalar_lea.hbm %s1629_s4, 256 }
 0x1a6   :  { %p1217_p1 = scmp.ne.s32.totalorder %s1629_s4, %s1216_s13  ;;  %p1220_p2 = scmp.lt.u32.totalorder %s1216_s13, %s1629_s4 }
 0x1a8   :  { %p1222_p3 = pnand %p1220_p2, %p1217_p1 }
 0x1aa   :  { %1225 = shalt.err (!%p1222_p3)
}
 0x1ab   :  { %913 = dma.vmem_to_hbm [thread:$0]  %s911_s7, 256, %s1629_s4, [#allocation9]   ;;  %891 = vst [vmem:[#allocation10 + $0x8] sm:$0xff] %v889_v63 }
 0x1ac   :  { %s1226_s18 = scalar_lea.vmem %s921_s9, 256  ;;  %p1231_p5 = scmp.lt.s32.totalorder %s921_s9, %s921_s9 }
 0x1ad   :  { %p1227_p4 = scmp.ne.s32.totalorder %s921_s9, %s1226_s18  ;;  %p1232_p6 = scmp.lt.s32.totalorder %s1226_s18, %s1226_s18 }
 0x1af   :  { %p1233_p7 = por %p1232_p6, %p1231_p5 }
 0x1b1   :  { %p1234_p8 = pnand %p1233_p7, %p1227_p4 }
 0x1b3   :  { %1237 = shalt.err (!%p1234_p8)
}
 0x1b4   :  { %s1238_s20 = scalar_lea.hbm %s1630_s5, 256 }
 0x1b5   :  { %p1239_p9 = scmp.ne.s32.totalorder %s1630_s5, %s1238_s20  ;;  %p1242_p10 = scmp.lt.u32.totalorder %s1238_s20, %s1630_s5 }
 0x1b7   :  { %p1244_p11 = pnand %p1242_p10, %p1239_p9 }
 0x1b9   :  { %1247 = shalt.err (!%p1244_p11)
}
 0x1ba   :  { %923 = dma.vmem_to_hbm [thread:$0]  %s921_s9, 256, %s1630_s5, [#allocation9]  }
 0x1bb   :  { %1252 = dma.done.wait [#allocation4], 8192  }
 0x1bc   :  { %1253 = vsyncadd [#allocation4], 4294959104 }
 0x1bd   :  { %1254 = dma.done.wait [#allocation9], 512  }
 0x1be   :  { %1255 = vsyncadd [#allocation9], 4294966784 }
 0x1bf   :  { %933 = vsyncpa [#allocation3], 1 }
 0x1c0   :  { %934 = vsyncpa [#allocation6], 1 }
 0x1c1   :  { %935 = vsyncpa [#allocation4], 1 }
 0x1c2   :  { %936 = vsyncpa [#allocation9], 1 }

</bundles_post_ra>
